<compile_context>
chip_gen: v5e
topology: v5e:2x2
jax: 0.10.0
libtpu: 0.0.40
codegen_flags: <defaults>
</compile_context>

<pallas_src>
import math
from functools import partial

import jax
import jax.numpy as jnp
from jax.experimental import pallas as pl
from jax.experimental.pallas import tpu as pltpu

_LANES = 128
_TILE_ROWS = 2048          # 2048 x 128 x 4B = 1 MiB per f32 input block
_LOG2 = math.log(2.0)


def _logcosh_kernel(yp_ref, yt_ref, o_ref, *, n_valid, tile_rows,
                    steps_per_slice, steps_total):
    c = pl.program_id(0)   # slice (TensorCore on v7x)
    i = pl.program_id(1)   # step within slice (reduction axis)

    # o_ref is the (8,128) resident accumulator block for this slice.
    @pl.when(i == 0)
    def _init():
        o_ref[...] = jnp.zeros_like(o_ref)

    x = yp_ref[...].astype(jnp.float32) - yt_ref[...].astype(jnp.float32)
    ax = jnp.abs(x)
    # log(cosh(x)) = |x| + log1p(exp(-2|x|)) - log(2)
    val = ax + jnp.log1p(jnp.exp(-2.0 * ax)) - _LOG2

    g = c * steps_per_slice + i            # global tile index
    last = steps_total - 1                 # only tiles >= last can hold pad/garbage

    @pl.when(g < last)
    def _steady():
        # Fully valid tile: pure VPU accumulation (no iota / mask / XLU reduce).
        o_ref[...] += jnp.sum(val.reshape(-1, 8, _LANES), axis=0)

    @pl.when(g >= last)
    def _tail():
        # Last real tile (and any purely virtual tile): mask flat idx >= n.
        row = jax.lax.broadcasted_iota(jnp.int32, val.shape, 0) + g * tile_rows
        col = jax.lax.broadcasted_iota(jnp.int32, val.shape, 1)
        flat = row * _LANES + col
        masked = jnp.where(flat < n_valid, val, 0.0)
        o_ref[...] += jnp.sum(masked.reshape(-1, 8, _LANES), axis=0)


def log_cosh_loss(y_pred: jax.Array, y_true: jax.Array) -> jax.Array:
    assert y_pred.shape == y_true.shape
    n = int(y_pred.size)

    yp = jnp.ravel(y_pred)          # free (bitcast) for contiguous inputs
    yt = jnp.ravel(y_true)

    # Pad only when numel is not a multiple of 8*128; keeps the (rows,128)
    # reshape free and every row-block (8,128)-aligned.
    chunk = 8 * _LANES
    n_pad = -(-n // chunk) * chunk
    if n_pad != n:
        yp = jnp.pad(yp, (0, n_pad - n))
        yt = jnp.pad(yt, (0, n_pad - n))
    rows = n_pad // _LANES
    yp = yp.reshape(rows, _LANES)
    yt = yt.reshape(rows, _LANES)

    tile_rows = min(_TILE_ROWS, rows)          # rows is a multiple of 8
    steps_total = pl.cdiv(rows, tile_rows)
    num_slices = 2 if steps_total >= 2 else 1  # v7x: one slice per TensorCore
    steps_per_slice = pl.cdiv(steps_total, num_slices)

    def in_map(c, i):
        # Clamp so a trailing virtual step (odd steps_total) re-reads the last
        # real block; its contribution is fully masked out in the kernel.
        return (jnp.minimum(c * steps_per_slice + i, steps_total - 1), 0)

    kernel = partial(_logcosh_kernel, n_valid=n, tile_rows=tile_rows,
                     steps_per_slice=steps_per_slice, steps_total=steps_total)

    bytes_accessed = int(
        n * (y_pred.dtype.itemsize + y_true.dtype.itemsize)
        + num_slices * 8 * _LANES * 4)

    out = pl.pallas_call(
        kernel,
        out_shape=jax.ShapeDtypeStruct((num_slices * 8, _LANES), jnp.float32),
        grid_spec=pltpu.PrefetchScalarGridSpec(
            num_scalar_prefetch=0,
            grid=(num_slices, steps_per_slice),
            in_specs=[
                pl.BlockSpec((tile_rows, _LANES), in_map),
                pl.BlockSpec((tile_rows, _LANES), in_map),
            ],
            out_specs=pl.BlockSpec((8, _LANES), lambda c, i: (c, 0)),
        ),
        compiler_params=pltpu.CompilerParams(
            dimension_semantics=("parallel", "arbitrary")),
        cost_estimate=pl.CostEstimate(
            flops=8 * n, transcendentals=2 * n, bytes_accessed=bytes_accessed),
    )(yp, yt)

    # Tiny final reduce + mean normalization (1024*num_slices f32 values).
    return jnp.sum(out) / jnp.float32(n)


class LogCoshLoss:
    """JAX/Pallas equivalent of the PyTorch LogCoshLoss module (no params)."""

    def __call__(self, y_pred, y_true):
        return log_cosh_loss(y_pred, y_true)


def _ref_loss(y_pred, y_true):
    x = (y_pred - y_true).astype(jnp.float32)
    return jnp.mean(x + jax.nn.softplus(-2.0 * x) - math.log(2.0))


if __name__ == "__main__":
    loss_fn = LogCoshLoss()
    key = jax.random.PRNGKey(0)

    # (shape, rtol) — covers: aligned single tile, ragged+masked tail,
    # multi-tile 2-slice with a clamped virtual step, and padded multi-tile.
    cases = [
        ((2, 4, 16, 16), 1e-5),
        ((3, 5, 7), 1e-5),
        ((5, 1024, 128), 1e-4),
        ((4, 1000, 100), 1e-4),
    ]
    for shape, rtol in cases:
        key, k1, k2 = jax.random.split(key, 3)
        y_pred = jax.random.normal(k1, shape, dtype=jnp.float32)
        y_true = jax.random.normal(k2, shape, dtype=jnp.float32)

        loss = loss_fn(y_pred, y_true)
        loss = jax.block_until_ready(loss)

        ref = _ref_loss(y_pred, y_true)
        assert jnp.allclose(loss, ref, rtol=rtol, atol=1e-6), (shape, loss, ref)

    print("KERNEL_OK")
</pallas_src>

<mosaic_0001>
module attributes {stable_mosaic.version = 11 : i64} {
  func.func @_logcosh_kernel(%arg0: i32, %arg1: i32, %arg2: memref<16x128xf32, #tpu.memory_space<vmem>>, %arg3: memref<16x128xf32, #tpu.memory_space<vmem>>, %arg4: memref<8x128xf32, #tpu.memory_space<vmem>>) attributes {dimension_semantics = [#tpu.dimension_semantics<parallel>, #tpu.dimension_semantics<arbitrary>], iteration_bounds = array<i64: 1, 1>, scalar_prefetch = 0 : i64, scratch_operands = 0 : i64, tpu.core_type = #tpu.core_type<tc>, window_params = [{transform_indices = @transform_0, window_bounds = array<i64: 16, 128>}, {transform_indices = @transform_1, window_bounds = array<i64: 16, 128>}, {transform_indices = @transform_2, window_bounds = array<i64: 8, 128>}]} {
    %c0_i32 = arith.constant 0 : i32
    %0 = arith.cmpi eq, %arg1, %c0_i32 : i32
    %1 = arith.extui %0 : i1 to i32
    %c0_i32_0 = arith.constant 0 : i32
    %2 = arith.cmpi ne, %1, %c0_i32_0 : i32
    scf.if %2 {
      %cst_9 = arith.constant 0.000000e+00 : f32
      %22 = vector.broadcast %cst_9 : f32 to vector<8x128xf32>
      %c0_10 = arith.constant 0 : index
      %c0_11 = arith.constant 0 : index
      %23 = vector.load %arg4[%c0_10, %c0_11] : memref<8x128xf32, #tpu.memory_space<vmem>>, vector<8x128xf32>
      tpu.vector_store %arg4[%c0_10, %c0_11], %22 {strides = array<i32>} : memref<8x128xf32, #tpu.memory_space<vmem>>, vector<8x128xf32>,
    } else {
    }
    %c0 = arith.constant 0 : index
    %c0_1 = arith.constant 0 : index
    %3 = vector.load %arg2[%c0, %c0_1] : memref<16x128xf32, #tpu.memory_space<vmem>>, vector<16x128xf32>
    %c0_2 = arith.constant 0 : index
    %c0_3 = arith.constant 0 : index
    %4 = vector.load %arg3[%c0_2, %c0_3] : memref<16x128xf32, #tpu.memory_space<vmem>>, vector<16x128xf32>
    %5 = arith.subf %3, %4 : vector<16x128xf32>
    %6 = math.absf %5 : vector<16x128xf32>
    %cst = arith.constant -2.000000e+00 : f32
    %7 = vector.broadcast %cst : f32 to vector<16x128xf32>
    %8 = arith.mulf %7, %6 : vector<16x128xf32>
    %9 = math.exp %8 : vector<16x128xf32>
    %10 = math.log1p %9 : vector<16x128xf32>
    %11 = arith.addf %6, %10 : vector<16x128xf32>
    %cst_4 = arith.constant 0.693147182 : f32
    %12 = vector.broadcast %cst_4 : f32 to vector<16x128xf32>
    %13 = arith.subf %11, %12 : vector<16x128xf32>
    %c1_i32 = arith.constant 1 : i32
    %14 = arith.muli %arg0, %c1_i32 : i32
    %15 = arith.addi %14, %arg1 : i32
    %c0_i32_5 = arith.constant 0 : i32
    %16 = arith.cmpi slt, %15, %c0_i32_5 : i32
    %17 = arith.extui %16 : i1 to i32
    %c0_i32_6 = arith.constant 0 : i32
    %18 = arith.cmpi ne, %17, %c0_i32_6 : i32
    scf.if %18 {
      %c0_9 = arith.constant 0 : index
      %c0_10 = arith.constant 0 : index
      %22 = vector.load %arg4[%c0_9, %c0_10] : memref<8x128xf32, #tpu.memory_space<vmem>>, vector<8x128xf32>
      %23 = vector.shape_cast %13 : vector<16x128xf32> to vector<2x8x128xf32>
      %cst_11 = arith.constant dense<0.000000e+00> : vector<8x128xf32>
      %24 = vector.multi_reduction <add>, %23, %cst_11 [0] : vector<2x8x128xf32> to vector<8x128xf32>
      %25 = arith.addf %22, %24 : vector<8x128xf32>
      %c0_12 = arith.constant 0 : index
      %c0_13 = arith.constant 0 : index
      %26 = vector.load %arg4[%c0_12, %c0_13] : memref<8x128xf32, #tpu.memory_space<vmem>>, vector<8x128xf32>
      tpu.vector_store %arg4[%c0_12, %c0_13], %25 {strides = array<i32>} : memref<8x128xf32, #tpu.memory_space<vmem>>, vector<8x128xf32>,
    } else {
    }
    %c0_i32_7 = arith.constant 0 : i32
    %19 = arith.cmpi sge, %15, %c0_i32_7 : i32
    %20 = arith.extui %19 : i1 to i32
    %c0_i32_8 = arith.constant 0 : i32
    %21 = arith.cmpi ne, %20, %c0_i32_8 : i32
    scf.if %21 {
      %22 = tpu.iota {dimensions = array<i32: 0>} : vector<16x128xi32>
      %c16_i32 = arith.constant 16 : i32
      %23 = arith.muli %15, %c16_i32 : i32
      %24 = vector.broadcast %23 : i32 to vector<16x128xi32>
      %25 = arith.addi %22, %24 : vector<16x128xi32>
      %26 = tpu.iota {dimensions = array<i32: 1>} : vector<16x128xi32>
      %c128_i32 = arith.constant 128 : i32
      %27 = vector.broadcast %c128_i32 : i32 to vector<16x128xi32>
      %28 = arith.muli %25, %27 : vector<16x128xi32>
      %29 = arith.addi %28, %26 : vector<16x128xi32>
      %c2048_i32 = arith.constant 2048 : i32
      %30 = vector.broadcast %c2048_i32 : i32 to vector<16x128xi32>
      %31 = arith.cmpi slt, %29, %30 : vector<16x128xi32>
      %cst_9 = arith.constant 0.000000e+00 : f32
      %32 = vector.broadcast %cst_9 : f32 to vector<16x128xf32>
      %33 = arith.select %31, %13, %32 : vector<16x128xi1>, vector<16x128xf32>
      %c0_10 = arith.constant 0 : index
      %c0_11 = arith.constant 0 : index
      %34 = vector.load %arg4[%c0_10, %c0_11] : memref<8x128xf32, #tpu.memory_space<vmem>>, vector<8x128xf32>
      %35 = vector.shape_cast %33 : vector<16x128xf32> to vector<2x8x128xf32>
      %cst_12 = arith.constant dense<0.000000e+00> : vector<8x128xf32>
      %36 = vector.multi_reduction <add>, %35, %cst_12 [0] : vector<2x8x128xf32> to vector<8x128xf32>
      %37 = arith.addf %34, %36 : vector<8x128xf32>
      %c0_13 = arith.constant 0 : index
      %c0_14 = arith.constant 0 : index
      %38 = vector.load %arg4[%c0_13, %c0_14] : memref<8x128xf32, #tpu.memory_space<vmem>>, vector<8x128xf32>
      tpu.vector_store %arg4[%c0_13, %c0_14], %37 {strides = array<i32>} : memref<8x128xf32, #tpu.memory_space<vmem>>, vector<8x128xf32>,
    } else {
    }
    return
  }
  func.func @transform_0(%arg0: i32, %arg1: i32) -> (i32, i32) {
    %c1_i32 = arith.constant 1 : i32
    %0 = arith.muli %arg0, %c1_i32 : i32
    %1 = arith.addi %0, %arg1 : i32
    %c0_i32 = arith.constant 0 : i32
    %2 = arith.minsi %1, %c0_i32 : i32
    %c0_i32_0 = arith.constant 0 : i32
    %c0_i32_1 = arith.constant 0 : i32
    return %2, %c0_i32_0 : i32, i32
  }
  func.func @transform_1(%arg0: i32, %arg1: i32) -> (i32, i32) {
    %c1_i32 = arith.constant 1 : i32
    %0 = arith.muli %arg0, %c1_i32 : i32
    %1 = arith.addi %0, %arg1 : i32
    %c0_i32 = arith.constant 0 : i32
    %2 = arith.minsi %1, %c0_i32 : i32
    %c0_i32_0 = arith.constant 0 : i32
    %c0_i32_1 = arith.constant 0 : i32
    return %2, %c0_i32_0 : i32, i32
  }
  func.func @transform_2(%arg0: i32, %arg1: i32) -> (i32, i32) {
    %c0_i32 = arith.constant 0 : i32
    %c0_i32_0 = arith.constant 0 : i32
    return %arg0, %c0_i32 : i32, i32
  }
}

</mosaic_0001>

<bundles_post_ra>
// kernel: tpu_custom_call.1
= control target key start
LH: loop header
LB: loop body
LE: loop exit
PB: predicated region body
PF: predicated region fallthrough
CT: control target
= control target key end

     0   :  { %7 = vsyncpa [#allocation3], 0  ;;  %s284_s0 = inlined_call_operand.hbm [shape: f32[16,128], index: 0, kind: input, shape index: {}]   ;;  %s285_s1 = inlined_call_operand.hbm [shape: f32[16,128], index: 1, kind: input, shape index: {}]   ;;  %s286_s2 = inlined_call_operand.hbm [shape: f32[8,128], index: 2, kind: output, shape index: {}]  }
   0x1   :  { %8 = vsyncpa [#allocation6], 0 }
   0x2   :  { %9 = vsyncpa [#allocation4], 0  ;;  %s20_s11 = sshll.u32 %s284_s0, 4  ;;  %s255_s12 = smov [#allocation2]   ;;  %s21_s11 = int_to_ptr.hbm [resolvable:$true] %s20_s11 }
   0x3   :  { %s22_s13 = sshll.u32 %s255_s12, 4  ;;  %s39_s16 = sshll.u32 %s285_s1, 4  ;;  %s23_s13 = int_to_ptr.vmem [resolvable:$true] %s22_s13  ;;  %s40_s16 = int_to_ptr.hbm [resolvable:$true] %s39_s16 }
   0x4   :  { %s256_s17 = smov 128   ;;  %s257_s18 = smov 8  }
   0x5   :  { %28 = dma.hbm_to_vmem [thread:$0]  %s21_s11, 256, %s23_s13, [#allocation3], %s256_s17, %s256_s17, %s257_s18  }
   0x6   :  { %s258_s19 = smov [#allocation5]  }
   0x7   :  { %s41_s20 = sshll.u32 %s258_s19, 4  ;;  %s42_s20 = int_to_ptr.vmem [resolvable:$true] %s41_s20 }
   0x8   :  { %47 = dma.hbm_to_vmem [thread:$0]  %s40_s16, 256, %s42_s20, [#allocation6], %s256_s17, %s256_s17, %s257_s18  }
   0x9   :  { %249 = dma.done.wait [#allocation3], 256  }
   0xa   :  { %250 = vsyncadd [#allocation3], 4294967040 }
   0xb   :  { %251 = dma.done.wait [#allocation6], 256  }
   0xc   :  { %252 = vsyncadd [#allocation6], 4294967040  ;;  %v69_v0 = vld [vmem:[#allocation2] sm:$0xff]  ;;  %v70_v1 = vld [vmem:[#allocation2 + $0x8] sm:$0xff]  ;;  %v118_v12 = vlaneseq  ;;  %s259_s0 = smov [#allocation7]   ;;  %s146_s23 = sshll.u32 %s286_s2, 4  ;;  %s147_s23 = int_to_ptr.hbm [resolvable:$true] %s146_s23 }
   0xd   :  { %v71_v2 = vld [vmem:[#allocation5] sm:$0xff]  ;;  %v72_v3 = vld [vmem:[#allocation5 + $0x8] sm:$0xff]  ;;  %s144_s1 = sshll.u32 %s259_s0, 4  ;;  %s145_s1 = int_to_ptr.vmem [resolvable:$true] %s144_s1 }
   0xe   :  { %v73_v4 = vsub.f32 %v69_v0, %v71_v2  ;;  %v74_v5 = vsub.f32 %v70_v1, %v72_v3  ;;  %v119_v13 = vshrl.u32 %v118_v12, 7  ;;  %v126_v25 = vand.u32 127, %v118_v12 }
  0x10   :  { %v75_v6 = vand.u32 2147483647, %v73_v4  ;;  %v76_v7 = vand.u32 2147483647, %v74_v5  ;;  %v120_v20 = vadd.s32 8, %v119_v13  ;;  %v127_v26 = vmul.u32 128, %v119_v13 }
  0x12   :  { %v77_v8 = vmul.f32 -2.0, %v75_v6  ;;  %v78_v9 = vmul.f32 -2.0, %v76_v7  ;;  %v128_v27 = vmul.u32 128, %v120_v20  ;;  %v129_v33 = vadd.s32 %v127_v26, %v126_v25 }
  0x14   :  { %v79_v10 = vmul.f32 1.442695, %v77_v8  ;;  %v81_v11 = vmul.f32 1.442695, %v78_v9  ;;  %v130_v35 = vadd.s32 %v128_v27, %v126_v25  ;;  %vm131_vm2 = vcmp.lt.s32.totalorder %v129_v33, 2048 }
  0x16   :  { %169 = vpow2.f32 %v79_v10  ;;  %vm132_vm3 = vcmp.lt.s32.totalorder %v130_v35, 2048 }
  0x17   :  { %171 = vpow2.f32 %v81_v11 }
  0x1c   :  { %v170_v14 = vpop.eup %169 }
  0x1d   :  { %v172_v15 = vpop.eup %171  ;;  %v83_v16 = vadd.f32 1.0, %v170_v14  ;;  %v86_v17 = vmul.f32 -0.5, %v170_v14  ;;  %v89_v22 = vand.u32 2147483647, %v170_v14 }
  0x1e   :  { %v92_v18 = vadd.f32 1.0, %v172_v15  ;;  %v95_v19 = vmul.f32 -0.5, %v172_v15  ;;  %v98_v24 = vand.u32 2147483647, %v172_v15 }
  0x1f   :  { %173 = vlog2.f32 %v83_v16  ;;  %v87_v21 = vadd.f32 1.0, %v86_v17  ;;  %vm90_vm0 = vcmp.lt.f32.partialorder %v89_v22, 0.0004427343 }
  0x20   :  { %175 = vlog2.f32 %v92_v18  ;;  %v96_v23 = vadd.f32 1.0, %v95_v19  ;;  %vm99_vm1 = vcmp.lt.f32.partialorder %v98_v24, 0.0004427343 }
  0x21   :  { %v88_v28 = vmul.f32 %v170_v14, %v87_v21 }
  0x22   :  { %v97_v30 = vmul.f32 %v172_v15, %v96_v23 }
  0x25   :  { %v174_v29 = vpop.eup %173 }
  0x26   :  { %v176_v31 = vpop.eup %175  ;;  %v85_v32 = vmul.f32 0.6931472, %v174_v29 }
  0x27   :  { %v94_v34 = vmul.f32 0.6931472, %v176_v31 }
  0x28   :  { %v91_v36 = vsel %vm90_vm0, %v88_v28, %v85_v32 }
  0x29   :  { %v100_v37 = vsel %vm99_vm1, %v97_v30, %v94_v34  ;;  %v101_v38 = vadd.f32 %v91_v36, %v75_v6 }
  0x2a   :  { %v102_v39 = vadd.f32 %v100_v37, %v76_v7 }
  0x2b   :  { %v161_v40 = vadd.f32 -0.6931472, %v101_v38 }
  0x2c   :  { %v162_v41 = vadd.f32 -0.6931472, %v102_v39 }
  0x2d   :  { %v133_v42 = vsel %vm131_vm2, %v161_v40, 0.0 }
  0x2e   :  { %v134_v43 = vsel %vm132_vm3, %v162_v41, 0.0 }
  0x2f   :  { %v136_v44 = vadd.f32 %v134_v43, %v133_v42 }
  0x31   :  { %138 = vst [vmem:[#allocation7] sm:$0xff] %v136_v44 }
  0x32   :  { %149 = dma.vmem_to_hbm [thread:$0]  %s145_s1, 128, %s147_s23, [#allocation4]  }
  0x33   :  { %253 = dma.done.wait [#allocation4], 128  }
  0x34   :  { %254 = vsyncadd [#allocation4], 4294967168 }
  0x35   :  { %154 = vsyncpa [#allocation3], 1 }
  0x36   :  { %155 = vsyncpa [#allocation6], 1 }
  0x37   :  { %156 = vsyncpa [#allocation4], 1 }

</bundles_post_ra>
